<compile_context>
chip_gen: v7x
topology: tpu7x:2x2x1
jax: 0.10.0
libtpu: 0.0.40
codegen_flags: <defaults>
</compile_context>

<pallas_src>
import jax
import jax.numpy as jnp
from jax.experimental import pallas as pl
from jax.experimental.pallas import tpu as pltpu


# ----------------------------- kernels --------------------------------------

def _ffn_streamed_kernel(x_ref, w1_ref, b1_ref, w2_ref, b2_ref, o_ref, acc_ref):
    # x_ref : (tm, E)   w1_ref : (E, th)   b1_ref : (1, th)
    # w2_ref: (th, E)   b2_ref : (1, E)    o_ref  : (tm, E)
    # acc_ref: VMEM (tm, E) f32 accumulator, resident across the hidden axis.
    h_idx = pl.program_id(1)

    @pl.when(h_idx == 0)
    def _():
        # Seed the accumulator with b2 so the finalize path is a pure cast.
        acc_ref[...] = jnp.broadcast_to(b2_ref[...], acc_ref.shape)

    # First matmul for this hidden tile (MXU, f32 accumulation), bias + ReLU in f32.
    h = jnp.dot(x_ref[...], w1_ref[...], preferred_element_type=jnp.float32)
    h = jnp.maximum(h + b1_ref[...], 0.0)

    # Second matmul contribution for this hidden tile, accumulated in f32.
    acc_ref[...] += jnp.dot(h.astype(w2_ref.dtype), w2_ref[...],
                            preferred_element_type=jnp.float32)

    @pl.when(h_idx == pl.num_programs(1) - 1)
    def _():
        o_ref[...] = acc_ref[...].astype(o_ref.dtype)


def _ffn_resident_kernel(x_ref, w1_ref, b1_ref, w2_ref, b2_ref, o_ref):
    # Weights stay VMEM-resident across all row tiles (constant index_map),
    # so each grid step is one fused (tm,E)@(E,H) -> ReLU -> (tm,H)@(H,E).
    h = jnp.dot(x_ref[...], w1_ref[...], preferred_element_type=jnp.float32)
    h = jnp.maximum(h + b1_ref[...], 0.0)
    acc = jnp.dot(h.astype(w2_ref.dtype), w2_ref[...],
                  preferred_element_type=jnp.float32)
    o_ref[...] = (acc + b2_ref[...]).astype(o_ref.dtype)


# ----------------------------- helpers --------------------------------------

def _round_up(x, m):
    return (x + m - 1) // m * m


def _sublane(dtype):
    # f32 -> 8, bf16 -> 16, int8/fp8 -> 32 (packed-vreg sublane multiple).
    return max(8, 32 // jnp.dtype(dtype).itemsize)


def _largest_aligned_divisor(total, target, align):
    """Largest multiple of `align` that divides `total` and is <= target (or None)."""
    if align <= 0 or total % align != 0:
        return None
    t = (min(target, total) // align) * align
    while t >= align:
        if total % t == 0:
            return t
        t -= align
    return None


def _tpu_generation():
    try:
        kind = jax.devices()[0].device_kind.lower()
    except Exception:
        kind = ""
    for g in (7, 6, 5, 4):
        if f"v{g}" in kind:
            return g
    return 6  # conservative default


def _vmem_capacity_bytes(gen):
    try:
        return int(pltpu.get_tpu_info().vmem_capacity_bytes)
    except Exception:
        return (64 if gen >= 7 else 128) * 2**20


# ----------------------------- wrapper ---------------------------------------

def feed_forward(x, w1, b1, w2, b2, *, row_tile=None, hidden_tile=None,
                 compute_dtype=jnp.bfloat16, weights_resident=None):
    """Fused Linear(E->4E) -> ReLU -> Linear(4E->E) (+ identity Dropout).

    x: (B, T, E).  w1: (E, 4E), b1: (4E,), w2: (4E, E), b2: (E,)
    (w1/w2 are transposes of PyTorch nn.Linear weights).
    compute_dtype: MXU feed dtype (default bf16); accumulation stays f32.
    weights_resident: None = auto (fit-in-VMEM heuristic), True/False = force.
    """
    B, T, E = x.shape
    H = w1.shape[1]
    M = B * T
    out_dtype = x.dtype
    cdtype = jnp.dtype(compute_dtype if compute_dtype is not None else x.dtype)
    in_item = cdtype.itemsize
    out_item = jnp.dtype(out_dtype).itemsize

    gen = _tpu_generation()
    vmem_cap = _vmem_capacity_bytes(gen)
    # Headroom for Mosaic internal scratch: ~75% of 64 MiB (v7x), ~85% of 128 MiB.
    vmem_budget = int(vmem_cap * (0.75 if vmem_cap <= 64 * 2**20 else 0.85))
    mxu_align = 128 if gen <= 5 else 256

    # ---- row tile -----------------------------------------------------------
    sub = _sublane(cdtype)
    if row_tile is None:
        # v6e ridge (~640 flop/byte) wants a big tm; v7x ridge is lower (~311)
        # and has 2 TCs to feed; v5e usually takes the resident-weights path.
        row_tile = {5: 512, 6: 1024, 7: 512}.get(gen, 512)
    M_sub = _round_up(M, sub)
    tm = min(row_tile, M_sub)
    if gen >= 7 and M_sub >= 2 * sub:
        tm = min(tm, -(-M_sub // 2))          # ensure >= 2 row tiles (2 TCs)
    tm = _round_up(tm, sub)
    if M_sub % tm != 0:
        # Prefer a tm that divides M_sub (avoids extra padding / wasted MXU rows).
        t = (tm // sub) * sub
        while t >= sub:
            if M_sub % t == 0:
                tm = t
                break
            t -= sub
    M_pad = _round_up(M_sub, tm)
    n_row_tiles = M_pad // tm

    # ---- resident vs streamed weights ---------------------------------------
    weight_bytes = (w1.size + w2.size) * in_item
    resident_bytes = (2 * weight_bytes                 # W1+W2 (double-buffer alloc)
                      + 2 * tm * E * in_item           # x tiles (double-buffered)
                      + 2 * tm * E * out_item          # out tiles (double-buffered)
                      + tm * H * (4 + in_item)         # h f32 + compute-dtype cast
                      + 4 * (H + E))                   # biases (f32)
    if weights_resident is None:
        use_resident = resident_bytes <= vmem_budget
    else:
        use_resident = bool(weights_resident)

    # ---- hidden tile (streamed path only) ------------------------------------
    th = H
    if not use_resident:
        if hidden_tile is None:
            hidden_tile = {7: 512}.get(gen, 1024)
        fixed = (2 * tm * E * in_item                  # x tiles
                 + 2 * E * 4                           # b2 (f32)
                 + 2 * tm * E * out_item               # out tiles
                 + tm * E * 4)                         # f32 accumulator scratch
        per_th = (4 * E * in_item                      # W1 + W2 tiles (double-buffered)
                  + 2 * 4                              # b1 slice (f32)
                  + tm * (4 + in_item))                # h intermediate + cast copy
        th_budget = max((vmem_budget - fixed) // per_th, mxu_align)
        th_target = max(min(hidden_tile, th_budget, H), 1)
        th = None
        for align in (mxu_align, 128):
            th = _largest_aligned_divisor(H, th_target, align)
            if th is not None:
                break
        if th is None:
            th = H   # last resort for unusual hidden sizes

    # ---- layout / dtype prep -------------------------------------------------
    x2d = x.reshape(M, E)
    if M_pad != M:
        x2d = jnp.pad(x2d, ((0, M_pad - M), (0, 0)))
    x2d = x2d.astype(cdtype)
    w1c = w1.astype(cdtype)
    w2c = w2.astype(cdtype)
    b1_2d = b1.reshape(1, H).astype(jnp.float32)
    b2_2d = b2.reshape(1, E).astype(jnp.float32)

    # ---- VMEM limit / cost hint -----------------------------------------------
    if use_resident:
        vmem_est = resident_bytes
    else:
        vmem_est = (2 * tm * E * in_item + 2 * E * 4 + 2 * tm * E * out_item
                    + tm * E * 4
                    + th * (4 * E * in_item + 2 * 4 + tm * (4 + in_item)))
    vmem_limit = int(min(max(int(vmem_est * 1.2) + (1 << 20), 32 * 2**20),
                         vmem_budget))

    weight_stream_factor = 1 if use_resident else n_row_tiles
    cost = pl.CostEstimate(
        flops=4 * M_pad * E * H,                       # two M x E x H matmuls
        transcendentals=0,
        bytes_accessed=(in_item * M_pad * E
                        + in_item * (w1.size + w2.size) * weight_stream_factor
                        + 4 * (H + E)
                        + out_item * M_pad * E),
    )

    # ---- pallas_call ------------------------------------------------------------
    if use_resident:
        out2d = pl.pallas_call(
            _ffn_resident_kernel,
            out_shape=jax.ShapeDtypeStruct((M_pad, E), out_dtype),
            grid_spec=pltpu.PrefetchScalarGridSpec(
                num_scalar_prefetch=0,
                grid=(n_row_tiles,),
                in_specs=[
                    pl.BlockSpec((tm, E), lambda i: (i, 0)),   # x row tile
                    pl.BlockSpec((E, H), lambda i: (0, 0)),    # W1 (resident)
                    pl.BlockSpec((1, H), lambda i: (0, 0)),    # b1 (resident)
                    pl.BlockSpec((H, E), lambda i: (0, 0)),    # W2 (resident)
                    pl.BlockSpec((1, E), lambda i: (0, 0)),    # b2 (resident)
                ],
                out_specs=pl.BlockSpec((tm, E), lambda i: (i, 0)),
            ),
            compiler_params=pltpu.CompilerParams(
                dimension_semantics=("parallel",),
                vmem_limit_bytes=vmem_limit),
            cost_estimate=cost,
        )(x2d, w1c, b1_2d, w2c, b2_2d)
    else:
        out2d = pl.pallas_call(
            _ffn_streamed_kernel,
            out_shape=jax.ShapeDtypeStruct((M_pad, E), out_dtype),
            grid_spec=pltpu.PrefetchScalarGridSpec(
                num_scalar_prefetch=0,
                grid=(n_row_tiles, H // th),
                in_specs=[
                    pl.BlockSpec((tm, E), lambda i, j: (i, 0)),   # x row tile
                    pl.BlockSpec((E, th), lambda i, j: (0, j)),   # W1 hidden tile
                    pl.BlockSpec((1, th), lambda i, j: (0, j)),   # b1 hidden tile
                    pl.BlockSpec((th, E), lambda i, j: (j, 0)),   # W2 hidden tile
                    pl.BlockSpec((1, E), lambda i, j: (0, 0)),    # b2 (constant)
                ],
                out_specs=pl.BlockSpec((tm, E), lambda i, j: (i, 0)),
                scratch_shapes=[pltpu.VMEM((tm, E), jnp.float32)],
            ),
            compiler_params=pltpu.CompilerParams(
                dimension_semantics=("parallel", "arbitrary"),
                vmem_limit_bytes=vmem_limit),
            cost_estimate=cost,
        )(x2d, w1c, b1_2d, w2c, b2_2d)

    if M_pad != M:
        out2d = out2d[:M]
    return out2d.reshape(B, T, E)


# ----------------------------- test harness ----------------------------------

def reference(x2d, w1, b1, w2, b2):
    h = jnp.maximum(x2d @ w1 + b1, 0.0)
    return h @ w2 + b2


def _make_inputs(key, B, T, n_embed):
    hidden = 4 * n_embed
    kx, k1, k2, k3, k4 = jax.random.split(key, 5)
    x = jax.random.normal(kx, (B, T, n_embed), dtype=jnp.float32)
    # nn.Linear-style U(-1/sqrt(fan_in), 1/sqrt(fan_in)) init.
    bound1 = 1.0 / (n_embed ** 0.5)
    w1 = jax.random.uniform(k1, (n_embed, hidden), jnp.float32, -bound1, bound1)
    b1 = jax.random.uniform(k2, (hidden,), jnp.float32, -bound1, bound1)
    bound2 = 1.0 / (hidden ** 0.5)
    w2 = jax.random.uniform(k3, (hidden, n_embed), jnp.float32, -bound2, bound2)
    b2 = jax.random.uniform(k4, (n_embed,), jnp.float32, -bound2, bound2)
    return x, w1, b1, w2, b2


def _check(out, x, w1, b1, w2, b2, tag, atol, rtol):
    B, T, E = x.shape
    ref = reference(x.reshape(-1, E), w1, b1, w2, b2).reshape(B, T, E)
    assert out.shape == (B, T, E), tag
    assert jnp.allclose(out, ref, atol=atol, rtol=rtol), f"mismatch vs reference ({tag})"


if __name__ == "__main__":
    key = jax.random.PRNGKey(0)
    k_a, k_b, k_c = jax.random.split(key, 3)

    # 1) Shape implied by the module: (batch, seq, n_embed) = (2, 8, 32),
    #    default bf16 MXU feed, auto (resident-weights) path.
    x, w1, b1, w2, b2 = _make_inputs(k_a, B=2, T=8, n_embed=32)
    out = jax.block_until_ready(feed_forward(x, w1, b1, w2, b2))
    _check(out, x, w1, b1, w2, b2, "base-bf16", atol=5e-2, rtol=5e-2)

    # 2) Full-precision path (f32 MXU feed) on the same inputs.
    out = jax.block_until_ready(feed_forward(x, w1, b1, w2, b2, compute_dtype=None))
    _check(out, x, w1, b1, w2, b2, "base-f32", atol=1e-4, rtol=1e-4)

    # 3) Force the streamed-weights path: multiple row tiles + hidden-tile
    #    accumulation (bf16 and f32).
    x, w1, b1, w2, b2 = _make_inputs(k_b, B=2, T=16, n_embed=64)
    out = jax.block_until_ready(
        feed_forward(x, w1, b1, w2, b2, row_tile=16, hidden_tile=128,
                     weights_resident=False))
    _check(out, x, w1, b1, w2, b2, "streamed-bf16", atol=5e-2, rtol=5e-2)

    out = jax.block_until_ready(
        feed_forward(x, w1, b1, w2, b2, row_tile=16, hidden_tile=128,
                     weights_resident=False, compute_dtype=None))
    _check(out, x, w1, b1, w2, b2, "streamed-f32", atol=1e-4, rtol=1e-4)

    # 4) Ragged row count (M not a multiple of the sublane tile).
    x, w1, b1, w2, b2 = _make_inputs(k_c, B=2, T=5, n_embed=32)
    out = jax.block_until_ready(feed_forward(x, w1, b1, w2, b2))
    _check(out, x, w1, b1, w2, b2, "ragged", atol=5e-2, rtol=5e-2)

    print("KERNEL_OK")
</pallas_src>

<mosaic_0001>
module attributes {stable_mosaic.version = 11 : i64} {
  func.func @_ffn_resident_kernel(%arg0: i32, %arg1: memref<16x32xbf16, #tpu.memory_space<vmem>>, %arg2: memref<32x128xbf16, #tpu.memory_space<vmem>>, %arg3: memref<1x128xf32, #tpu.memory_space<vmem>>, %arg4: memref<128x32xbf16, #tpu.memory_space<vmem>>, %arg5: memref<1x32xf32, #tpu.memory_space<vmem>>, %arg6: memref<16x32xf32, #tpu.memory_space<vmem>>) attributes {dimension_semantics = [#tpu.dimension_semantics<parallel>], iteration_bounds = array<i64: 1>, scalar_prefetch = 0 : i64, scratch_operands = 0 : i64, tpu.core_type = #tpu.core_type<tc>, window_params = [{transform_indices = @transform_0, window_bounds = array<i64: 16, 32>}, {pipeline_mode = #tpu.pipeline_mode<synchronous>, transform_indices = @transform_1, window_bounds = array<i64: 32, 128>}, {pipeline_mode = #tpu.pipeline_mode<synchronous>, transform_indices = @transform_2, window_bounds = array<i64: 1, 128>}, {pipeline_mode = #tpu.pipeline_mode<synchronous>, transform_indices = @transform_3, window_bounds = array<i64: 128, 32>}, {pipeline_mode = #tpu.pipeline_mode<synchronous>, transform_indices = @transform_4, window_bounds = array<i64: 1, 32>}, {transform_indices = @transform_5, window_bounds = array<i64: 16, 32>}]} {
    %c0 = arith.constant 0 : index
    %c0_0 = arith.constant 0 : index
    %0 = vector.load %arg1[%c0, %c0_0] : memref<16x32xbf16, #tpu.memory_space<vmem>>, vector<16x32xbf16>
    %c0_1 = arith.constant 0 : index
    %c0_2 = arith.constant 0 : index
    %1 = vector.load %arg2[%c0_1, %c0_2] : memref<32x128xbf16, #tpu.memory_space<vmem>>, vector<32x128xbf16>
    %cst = arith.constant dense<0.000000e+00> : vector<16x128xf32>
    %2 = tpu.matmul %0, %1, %cst {dimension_numbers = #tpu.dot_dimension_numbers<[1], [0], [0], [1], [0, 0, 1, 1], [], []>} : vector<16x32xbf16>, vector<32x128xbf16>, vector<16x128xf32> -> vector<16x128xf32>
    %c0_3 = arith.constant 0 : index
    %c0_4 = arith.constant 0 : index
    %3 = vector.load %arg3[%c0_3, %c0_4] : memref<1x128xf32, #tpu.memory_space<vmem>>, vector<1x128xf32>
    %4 = vector.broadcast %3 : vector<1x128xf32> to vector<16x128xf32>
    %5 = arith.addf %2, %4 : vector<16x128xf32>
    %cst_5 = arith.constant 0.000000e+00 : f32
    %6 = vector.broadcast %cst_5 : f32 to vector<16x128xf32>
    %7 = arith.maximumf %5, %6 : vector<16x128xf32>
    %8 = arith.truncf %7 : vector<16x128xf32> to vector<16x128xbf16>
    %c0_6 = arith.constant 0 : index
    %c0_7 = arith.constant 0 : index
    %9 = vector.load %arg4[%c0_6, %c0_7] : memref<128x32xbf16, #tpu.memory_space<vmem>>, vector<128x32xbf16>
    %cst_8 = arith.constant dense<0.000000e+00> : vector<16x32xf32>
    %10 = tpu.matmul %8, %9, %cst_8 {dimension_numbers = #tpu.dot_dimension_numbers<[1], [0], [0], [1], [0, 0, 1, 1], [], []>} : vector<16x128xbf16>, vector<128x32xbf16>, vector<16x32xf32> -> vector<16x32xf32>
    %c0_9 = arith.constant 0 : index
    %c0_10 = arith.constant 0 : index
    %11 = vector.load %arg5[%c0_9, %c0_10] : memref<1x32xf32, #tpu.memory_space<vmem>>, vector<1x32xf32>
    %12 = vector.broadcast %11 : vector<1x32xf32> to vector<16x32xf32>
    %13 = arith.addf %10, %12 : vector<16x32xf32>
    %c0_11 = arith.constant 0 : index
    %c0_12 = arith.constant 0 : index
    %14 = vector.load %arg6[%c0_11, %c0_12] : memref<16x32xf32, #tpu.memory_space<vmem>>, vector<16x32xf32>
    tpu.vector_store %arg6[%c0_11, %c0_12], %13 {strides = array<i32>} : memref<16x32xf32, #tpu.memory_space<vmem>>, vector<16x32xf32>,
    return
  }
  func.func @transform_0(%arg0: i32) -> (i32, i32) {
    %c0_i32 = arith.constant 0 : i32
    %c0_i32_0 = arith.constant 0 : i32
    return %arg0, %c0_i32 : i32, i32
  }
  func.func @transform_1(%arg0: i32) -> (i32, i32) {
    %c0_i32 = arith.constant 0 : i32
    %c0_i32_0 = arith.constant 0 : i32
    %c0_i32_1 = arith.constant 0 : i32
    return %c0_i32, %c0_i32_0 : i32, i32
  }
  func.func @transform_2(%arg0: i32) -> (i32, i32) {
    %c0_i32 = arith.constant 0 : i32
    %c0_i32_0 = arith.constant 0 : i32
    %c0_i32_1 = arith.constant 0 : i32
    return %c0_i32, %c0_i32_0 : i32, i32
  }
  func.func @transform_3(%arg0: i32) -> (i32, i32) {
    %c0_i32 = arith.constant 0 : i32
    %c0_i32_0 = arith.constant 0 : i32
    %c0_i32_1 = arith.constant 0 : i32
    return %c0_i32, %c0_i32_0 : i32, i32
  }
  func.func @transform_4(%arg0: i32) -> (i32, i32) {
    %c0_i32 = arith.constant 0 : i32
    %c0_i32_0 = arith.constant 0 : i32
    %c0_i32_1 = arith.constant 0 : i32
    return %c0_i32, %c0_i32_0 : i32, i32
  }
  func.func @transform_5(%arg0: i32) -> (i32, i32) {
    %c0_i32 = arith.constant 0 : i32
    %c0_i32_0 = arith.constant 0 : i32
    return %arg0, %c0_i32 : i32, i32
  }
}

</mosaic_0001>

<bundles_post_ra>
// kernel: tpu_custom_call.1
= control target key start
LH: loop header
LB: loop body
LE: loop exit
PB: predicated region body
PF: predicated region fallthrough
CT: control target
= control target key end

     0   :  { %v324_v1 = vmov 0.0   ;;  %vm325_vm0 = vmmov 0   ;;  %vm52_vm1 = vcmask 261120   ;;  %s413_s0 = inlined_call_operand.vmem [shape: bf16[16,32], index: 0, kind: input, shape index: {}]   ;;  %s414_s1 = inlined_call_operand.vmem [shape: bf16[32,128], index: 1, kind: input, shape index: {}]   ;;  %s415_s2 = inlined_call_operand.vmem [shape: f32[1,128], index: 2, kind: input, shape index: {}]   ;;  %s416_s3 = inlined_call_operand.vmem [shape: bf16[128,32], index: 3, kind: input, shape index: {}]   ;;  %s417_s4 = inlined_call_operand.vmem [shape: f32[1,32], index: 4, kind: input, shape index: {}]   ;;  %s418_s5 = inlined_call_operand.hbm [shape: f32[16,32], index: 5, kind: output, shape index: {}]  }
   0x1   :  { %v289_v0 = vld [vmem:[%s414_s1] sm:$0xff]   ;;  %256 = vmatprep.subr.bf16.mxu0 %v324_v1  ;;  %264 = vmatprep.subr.bf16.mxu1 %v324_v1  ;;  %v290_v2 = vld [vmem:[%s414_s1 + $0x8] sm:$0xff]   ;;  %v294_v6 = vld [vmem:[%s416_s3 + $0x10] sm:$0xff]  }
   0x2   :  { %257 = vmatpush3.bf16.msra.mxu0 %v289_v0  ;;  %260 = vmatprep.mubr.msk.bf16.mxu0 %vm325_vm0, %v324_v1  ;;  %v292_v3 = vld [vmem:[%s416_s3] sm:$0xff]   ;;  %v293_v5 = vld [vmem:[%s416_s3 + $0x8] sm:$0xff]  }
   0x3   :  { %258 = vmatprep.subr.bf16.mxu0 %v324_v1  ;;  %280 = vmatprep.mubr.msk.bf16.mxu1 %vm325_vm0, %v324_v1  ;;  %v291_v4 = vld [vmem:[%s413_s0] sm:$0xff]  }
   0x4   :  { %265 = vmatpush3.bf16.msra.mxu1 %v292_v3 }
   0x5   :  { %266 = vmatprep.subr.bf16.mxu1 %v324_v1 }
   0x6   :  { %259 = vmatpush3.bf16.msra.mxu0 %v290_v2 }
   0x8   :  { %267 = vmatpush3.bf16.msra.mxu1 %v293_v5 }
   0x9   :  { %261 = vmatmul.mubr.msk.bf16.vlgmr.msra.gmra.mrb[0].mxu0 %vm52_vm1, %v291_v4  ;;  %268 = vmatprep.subr.bf16.mxu1 %v324_v1 }
   0xa   :  { %10 = vsyncpa [#allocation3], 0  ;;  %v295_v7 = vld [vmem:[%s416_s3 + $0x18] sm:$0xff]   ;;  %v296_v8 = vld [vmem:[%s416_s3 + $0x20] sm:$0xff]  }
   0xb   :  { %v297_v9 = vld [vmem:[%s416_s3 + $0x28] sm:$0xff]   ;;  %v298_v10 = vld [vmem:[%s416_s3 + $0x30] sm:$0xff]   ;;  %v299_v11 = vld [vmem:[%s416_s3 + $0x38] sm:$0xff]   ;;  %s326_s3 = smov [#allocation2]  }
   0xc   :  { %269 = vmatpush3.bf16.msra.mxu1 %v294_v6  ;;  %v230_v12 = vld [vmem:[%s415_s2] ss:$0 sm:$0xff]  ;;  %s219_s17 = sshll.u32 %s326_s3, 4  ;;  %s220_s17 = int_to_ptr.vmem [resolvable:$true] %s219_s17 }
   0xd   :  { %270 = vmatprep.subr.bf16.mxu1 %v324_v1  ;;  %v235_v22 = vld [vmem:[%s417_s4] ss:$0 sm:$0xff]  ;;  %s300_s2 = scalar_lea.vmem %s220_s17, 256  ;;  %p305_p1 = scmp.lt.s32.totalorder %s220_s17, %s220_s17 }
   0xe   :  { %p301_p0 = scmp.ne.s32.totalorder %s220_s17, %s300_s2  ;;  %p306_p2 = scmp.lt.s32.totalorder %s300_s2, %s300_s2 }
  0x10   :  { %271 = vmatpush3.bf16.msra.mxu1 %v295_v7  ;;  %p307_p3 = por %p306_p2, %p305_p1 }
  0x11   :  { %272 = vmatprep.subr.bf16.mxu1 %v324_v1 }
  0x12   :  { %p308_p4 = pnand %p307_p3, %p301_p0 }
  0x14   :  { %273 = vmatpush3.bf16.msra.mxu1 %v296_v8 }
  0x15   :  { %274 = vmatprep.subr.bf16.mxu1 %v324_v1 }
  0x18   :  { %275 = vmatpush3.bf16.msra.mxu1 %v297_v9 }
  0x19   :  { %276 = vmatprep.subr.bf16.mxu1 %v324_v1 }
  0x1c   :  { %277 = vmatpush3.bf16.msra.mxu1 %v298_v10 }
  0x1d   :  { %278 = vmatprep.subr.bf16.mxu1 %v324_v1 }
  0x20   :  { %279 = vmatpush3.bf16.msra.mxu1 %v299_v11 }
  0xdc   :  { %v90_v13 = vpop.f32.mrb[0].mxu0 }
  0xdd   :  { %v91_v14 = vadd.f32 %v230_v12, %v90_v13  ;;  %v262_v15 = vpop.f32.mrb[1].mxu0 }
  0xde   :  { %v93_v16 = vpop.f32.mrb[2].mxu0 }
  0xdf   :  { %v94_v17 = vadd.f32 %v230_v12, %v93_v16  ;;  %v263_v18 = vpop.f32.mrb[3].mxu0  ;;  %v97_v19 = vmax.f32 %v91_v14, 0.0 }
  0xe1   :  { %v98_v20 = vmax.f32 %v94_v17, 0.0 }
  0xe3   :  { %v99_v21 = vpack.c.bf16 %v98_v20, %v97_v19 }
  0xe5   :  { %281 = vmatmul.mubr.bf16.vlgmr.msra.gmra.mrb[0].mxu1 %v99_v21 }
 0x1b8   :  { %v205_v23 = vpop.f32.mrb[0].mxu1 }
 0x1b9   :  { %v206_v24 = vadd.f32 %v235_v22, %v205_v23  ;;  %v282_v25 = vpop.f32.mrb[1].mxu1 }
 0x1ba   :  { %v208_v26 = vpop.f32.mrb[2].mxu1 }
 0x1bb   :  { %212 = vst.msk [vmem:[#allocation2] sm:$0xff] %vm52_vm1, %v206_v24  ;;  %v209_v27 = vadd.f32 %v235_v22, %v208_v26  ;;  %v283_v28 = vpop.f32.mrb[3].mxu1 }
 0x1bd   :  { %213 = vst.msk [vmem:[#allocation2 + $0x8] sm:$0xff] %vm52_vm1, %v209_v27 }
 0x1be   :  { %311 = shalt.err (!%p308_p4)
}
 0x1bf   :  { %s312_s19 = scalar_lea.hbm %s418_s5, 256 }
 0x1c0   :  { %p313_p5 = scmp.ne.s32.totalorder %s418_s5, %s312_s19  ;;  %p316_p6 = scmp.lt.u32.totalorder %s312_s19, %s418_s5 }
 0x1c2   :  { %p318_p7 = pnand %p316_p6, %p313_p5 }
 0x1c4   :  { %321 = shalt.err (!%p318_p7)
}
 0x1c5   :  { %s327_s24 = smov 128   ;;  %s328_s25 = smov 8  }
 0x1c6   :  { %225 = dma.vmem_to_hbm [thread:$0]  %s220_s17, 256, %s418_s5, [#allocation3], %s327_s24, %s327_s24, %s328_s25  }
 0x1c7   :  { %322 = dma.done.wait [#allocation3], 256  }
 0x1c8   :  { %323 = vsyncadd [#allocation3], 4294967040 }
 0x1c9   :  { %229 = vsyncpa [#allocation3], 1 }

</bundles_post_ra>
